<compile_context>
chip_gen: v6e
topology: v6e:2x2x1
jax: 0.10.0
libtpu: 0.0.40
codegen_flags: <defaults>
</compile_context>

<pallas_src>
import functools

import jax
import jax.numpy as jnp
from jax.experimental import pallas as pl
from jax.experimental.pallas import tpu as pltpu


def _round_up(x, m):
    return ((x + m - 1) // m) * m


# ----------------------------------------------------------------------------
# Pallas kernel: fused GEMM + bias + ReLU.
#   x_ref: (TM, Kp) bf16   w_ref: (Kp, Np) bf16   b_ref: (1, Np) f32
#   o_ref: (TM, Np) f32
# ----------------------------------------------------------------------------
def _gemm_bias_relu_kernel(x_ref, w_ref, b_ref, o_ref):
    acc = jnp.dot(x_ref[...], w_ref[...], preferred_element_type=jnp.float32)
    acc = acc + b_ref[...]                       # (1, Np) broadcasts over rows
    o_ref[...] = jnp.maximum(acc, 0.0).astype(o_ref.dtype)


def _gemm_bias_relu(patches, weight, bias):
    """patches: (M, K) f32; weight: (K, N) f32; bias: (N,) f32 -> (M, N) f32."""
    M, K = patches.shape
    N = weight.shape[1]

    # Lane/sublane alignment: N, K -> multiples of 128; M -> multiple of TM.
    Kp = _round_up(K, 128)
    Np = _round_up(N, 128)
    TM = min(256, _round_up(M, 16))      # MXU-friendly M tile, capped for VMEM
    Mp = _round_up(M, TM)
    grid_m = Mp // TM

    x = jnp.pad(patches.astype(jnp.bfloat16), ((0, Mp - M), (0, Kp - K)))
    w = jnp.pad(weight.astype(jnp.bfloat16), ((0, Kp - K), (0, Np - N)))
    b = jnp.pad(bias.astype(jnp.float32).reshape(1, N), ((0, 0), (0, Np - N)))

    # VMEM budget: double-buffered LHS + resident RHS/bias + double-buffered out.
    tile_bytes = (2 * TM * Kp * 2) + (Kp * Np * 2) + (Np * 4) + (2 * TM * Np * 4)
    vmem_limit = int(min(48 * 1024 * 1024, max(32 * 1024 * 1024, 4 * tile_bytes)))

    out = pl.pallas_call(
        _gemm_bias_relu_kernel,
        out_shape=jax.ShapeDtypeStruct((Mp, Np), jnp.float32),
        grid=(grid_m,),
        in_specs=[
            pl.BlockSpec((TM, Kp), lambda i: (i, 0)),   # LHS tile, pipelined
            pl.BlockSpec((Kp, Np), lambda i: (0, 0)),   # weight resident in VMEM
            pl.BlockSpec((1, Np), lambda i: (0, 0)),    # bias resident in VMEM
        ],
        out_specs=pl.BlockSpec((TM, Np), lambda i: (i, 0)),
        compiler_params=pltpu.CompilerParams(
            dimension_semantics=("parallel",),          # megacore / 2-TC sharding
            vmem_limit_bytes=vmem_limit),
    )(x, w, b)
    return out[:M, :N]


# ----------------------------------------------------------------------------
# Conv 3x3 stride-2 pad-1 + ReLU, via im2col (glue) + Pallas fused GEMM.
# ----------------------------------------------------------------------------
def _conv3x3_s2_relu(x_nhwc, weight, bias):
    """x_nhwc: (B, H, W, Cin); weight: (3, 3, Cin, Cout); bias: (Cout,)."""
    B, H, W, Cin = x_nhwc.shape
    Cout = weight.shape[-1]
    Ho, Wo = (H + 1) // 2, (W + 1) // 2   # ceil(H/2): matches Conv2d(k=3,s=2,p=1)

    xp = jnp.pad(x_nhwc, ((0, 0), (1, 1), (1, 1), (0, 0)))  # padding=1

    # im2col: gather the 9 taps (strided slices, no FLOPs).
    taps = []
    for kh in range(3):
        for kw in range(3):
            taps.append(
                jax.lax.slice(
                    xp,
                    (0, kh, kw, 0),
                    (B, kh + 2 * (Ho - 1) + 1, kw + 2 * (Wo - 1) + 1, Cin),
                    (1, 2, 2, 1),
                )
            )
    patches = jnp.concatenate(taps, axis=-1)            # (B, Ho, Wo, 9*Cin)
    patches = patches.reshape(B * Ho * Wo, 9 * Cin)     # (M, K)

    w2d = weight.reshape(9 * Cin, Cout)                 # same (kh, kw, ci) order
    out = _gemm_bias_relu(patches, w2d, bias)           # (M, Cout)
    return out.reshape(B, Ho, Wo, Cout)


# ----------------------------------------------------------------------------
# Deterministic parameter init (synthetic; __init__ shapes only, no checkpoint).
# ----------------------------------------------------------------------------
def init_params(key, in_channels, stage_channels):
    params = []
    c_in = in_channels
    for i, c_out in enumerate(stage_channels):
        kw_key, kb_key = jax.random.split(jax.random.fold_in(key, i))
        fan_in = 9 * c_in
        w = jax.random.normal(kw_key, (3, 3, c_in, c_out), jnp.float32)
        w = w * (1.0 / jnp.sqrt(jnp.float32(fan_in)))
        b = 0.01 * jax.random.normal(kb_key, (c_out,), jnp.float32)
        params.append((w, b))
        c_in = c_out
    return params


# ----------------------------------------------------------------------------
# midas_encoder.forward: x -> (layer_1, layer_2, layer_3, layer_4)
# Public interface is NCHW, matching the PyTorch module.
# ----------------------------------------------------------------------------
@functools.partial(jax.jit, static_argnums=())
def midas_encoder_forward(x_nchw, params):
    x = jnp.transpose(x_nchw, (0, 2, 3, 1))  # NCHW -> NHWC
    feats_nchw = []
    for (w, b) in params:
        x = _conv3x3_s2_relu(x, w, b)
        feats_nchw.append(jnp.transpose(x, (0, 3, 1, 2)))  # NHWC -> NCHW
    return tuple(feats_nchw)


if __name__ == "__main__":
    key = jax.random.PRNGKey(0)
    k_in, k_par = jax.random.split(key)

    # Small synthetic shapes consistent with the forward pass:
    # input (B, C, H, W) = (2, 4, 16, 16); four stages, each /2 spatial and
    # doubling channels: 8 -> 16 -> 32 -> 64.
    B, C, H, W = 2, 4, 16, 16
    stage_channels = (8, 16, 32, 64)

    x = jax.random.normal(k_in, (B, C, H, W), jnp.float32)
    params = init_params(k_par, C, stage_channels)

    layer_1, layer_2, layer_3, layer_4 = midas_encoder_forward(x, params)
    jax.block_until_ready((layer_1, layer_2, layer_3, layer_4))

    assert layer_1.shape == (B, 8, 8, 8)
    assert layer_2.shape == (B, 16, 4, 4)
    assert layer_3.shape == (B, 32, 2, 2)
    assert layer_4.shape == (B, 64, 1, 1)
    assert all(jnp.all(jnp.isfinite(l)) for l in (layer_1, layer_2, layer_3, layer_4))

    print("KERNEL_OK")
</pallas_src>

<mosaic_0001>
module attributes {stable_mosaic.version = 11 : i64} {
  func.func @_gemm_bias_relu_kernel(%arg0: i32, %arg1: memref<128x128xbf16, #tpu.memory_space<vmem>>, %arg2: memref<128x128xbf16, #tpu.memory_space<vmem>>, %arg3: memref<1x128xf32, #tpu.memory_space<vmem>>, %arg4: memref<128x128xf32, #tpu.memory_space<vmem>>) attributes {dimension_semantics = [#tpu.dimension_semantics<parallel>], iteration_bounds = array<i64: 1>, scalar_prefetch = 0 : i64, scratch_operands = 0 : i64, tpu.core_type = #tpu.core_type<tc>, window_params = [{transform_indices = @transform_0, window_bounds = array<i64: 128, 128>}, {pipeline_mode = #tpu.pipeline_mode<synchronous>, transform_indices = @transform_1, window_bounds = array<i64: 128, 128>}, {pipeline_mode = #tpu.pipeline_mode<synchronous>, transform_indices = @transform_2, window_bounds = array<i64: 1, 128>}, {transform_indices = @transform_3, window_bounds = array<i64: 128, 128>}]} {
    %c0 = arith.constant 0 : index
    %c0_0 = arith.constant 0 : index
    %0 = vector.load %arg1[%c0, %c0_0] : memref<128x128xbf16, #tpu.memory_space<vmem>>, vector<128x128xbf16>
    %c0_1 = arith.constant 0 : index
    %c0_2 = arith.constant 0 : index
    %1 = vector.load %arg2[%c0_1, %c0_2] : memref<128x128xbf16, #tpu.memory_space<vmem>>, vector<128x128xbf16>
    %cst = arith.constant dense<0.000000e+00> : vector<128x128xf32>
    %2 = tpu.matmul %0, %1, %cst {dimension_numbers = #tpu.dot_dimension_numbers<[1], [0], [0], [1], [0, 0, 1, 1], [], []>} : vector<128x128xbf16>, vector<128x128xbf16>, vector<128x128xf32> -> vector<128x128xf32>
    %c0_3 = arith.constant 0 : index
    %c0_4 = arith.constant 0 : index
    %3 = vector.load %arg3[%c0_3, %c0_4] : memref<1x128xf32, #tpu.memory_space<vmem>>, vector<1x128xf32>
    %4 = vector.broadcast %3 : vector<1x128xf32> to vector<128x128xf32>
    %5 = arith.addf %2, %4 : vector<128x128xf32>
    %cst_5 = arith.constant 0.000000e+00 : f32
    %6 = vector.broadcast %cst_5 : f32 to vector<128x128xf32>
    %7 = arith.maximumf %5, %6 : vector<128x128xf32>
    %c0_6 = arith.constant 0 : index
    %c0_7 = arith.constant 0 : index
    %8 = vector.load %arg4[%c0_6, %c0_7] : memref<128x128xf32, #tpu.memory_space<vmem>>, vector<128x128xf32>
    tpu.vector_store %arg4[%c0_6, %c0_7], %7 {strides = array<i32>} : memref<128x128xf32, #tpu.memory_space<vmem>>, vector<128x128xf32>,
    return
  }
  func.func @transform_0(%arg0: i32) -> (i32, i32) {
    %c0_i32 = arith.constant 0 : i32
    %c0_i32_0 = arith.constant 0 : i32
    return %arg0, %c0_i32 : i32, i32
  }
  func.func @transform_1(%arg0: i32) -> (i32, i32) {
    %c0_i32 = arith.constant 0 : i32
    %c0_i32_0 = arith.constant 0 : i32
    %c0_i32_1 = arith.constant 0 : i32
    return %c0_i32, %c0_i32_0 : i32, i32
  }
  func.func @transform_2(%arg0: i32) -> (i32, i32) {
    %c0_i32 = arith.constant 0 : i32
    %c0_i32_0 = arith.constant 0 : i32
    %c0_i32_1 = arith.constant 0 : i32
    return %c0_i32, %c0_i32_0 : i32, i32
  }
  func.func @transform_3(%arg0: i32) -> (i32, i32) {
    %c0_i32 = arith.constant 0 : i32
    %c0_i32_0 = arith.constant 0 : i32
    return %arg0, %c0_i32 : i32, i32
  }
}

module attributes {stable_mosaic.version = 11 : i64} {
  func.func @_gemm_bias_relu_kernel(%arg0: i32, %arg1: memref<32x128xbf16, #tpu.memory_space<vmem>>, %arg2: memref<128x128xbf16, #tpu.memory_space<vmem>>, %arg3: memref<1x128xf32, #tpu.memory_space<vmem>>, %arg4: memref<32x128xf32, #tpu.memory_space<vmem>>) attributes {dimension_semantics = [#tpu.dimension_semantics<parallel>], iteration_bounds = array<i64: 1>, scalar_prefetch = 0 : i64, scratch_operands = 0 : i64, tpu.core_type = #tpu.core_type<tc>, window_params = [{transform_indices = @transform_0, window_bounds = array<i64: 32, 128>}, {pipeline_mode = #tpu.pipeline_mode<synchronous>, transform_indices = @transform_1, window_bounds = array<i64: 128, 128>}, {pipeline_mode = #tpu.pipeline_mode<synchronous>, transform_indices = @transform_2, window_bounds = array<i64: 1, 128>}, {transform_indices = @transform_3, window_bounds = array<i64: 32, 128>}]} {
    %c0 = arith.constant 0 : index
    %c0_0 = arith.constant 0 : index
    %0 = vector.load %arg1[%c0, %c0_0] : memref<32x128xbf16, #tpu.memory_space<vmem>>, vector<32x128xbf16>
    %c0_1 = arith.constant 0 : index
    %c0_2 = arith.constant 0 : index
    %1 = vector.load %arg2[%c0_1, %c0_2] : memref<128x128xbf16, #tpu.memory_space<vmem>>, vector<128x128xbf16>
    %cst = arith.constant dense<0.000000e+00> : vector<32x128xf32>
    %2 = tpu.matmul %0, %1, %cst {dimension_numbers = #tpu.dot_dimension_numbers<[1], [0], [0], [1], [0, 0, 1, 1], [], []>} : vector<32x128xbf16>, vector<128x128xbf16>, vector<32x128xf32> -> vector<32x128xf32>
    %c0_3 = arith.constant 0 : index
    %c0_4 = arith.constant 0 : index
    %3 = vector.load %arg3[%c0_3, %c0_4] : memref<1x128xf32, #tpu.memory_space<vmem>>, vector<1x128xf32>
    %4 = vector.broadcast %3 : vector<1x128xf32> to vector<32x128xf32>
    %5 = arith.addf %2, %4 : vector<32x128xf32>
    %cst_5 = arith.constant 0.000000e+00 : f32
    %6 = vector.broadcast %cst_5 : f32 to vector<32x128xf32>
    %7 = arith.maximumf %5, %6 : vector<32x128xf32>
    %c0_6 = arith.constant 0 : index
    %c0_7 = arith.constant 0 : index
    %8 = vector.load %arg4[%c0_6, %c0_7] : memref<32x128xf32, #tpu.memory_space<vmem>>, vector<32x128xf32>
    tpu.vector_store %arg4[%c0_6, %c0_7], %7 {strides = array<i32>} : memref<32x128xf32, #tpu.memory_space<vmem>>, vector<32x128xf32>,
    return
  }
  func.func @transform_0(%arg0: i32) -> (i32, i32) {
    %c0_i32 = arith.constant 0 : i32
    %c0_i32_0 = arith.constant 0 : i32
    return %arg0, %c0_i32 : i32, i32
  }
  func.func @transform_1(%arg0: i32) -> (i32, i32) {
    %c0_i32 = arith.constant 0 : i32
    %c0_i32_0 = arith.constant 0 : i32
    %c0_i32_1 = arith.constant 0 : i32
    return %c0_i32, %c0_i32_0 : i32, i32
  }
  func.func @transform_2(%arg0: i32) -> (i32, i32) {
    %c0_i32 = arith.constant 0 : i32
    %c0_i32_0 = arith.constant 0 : i32
    %c0_i32_1 = arith.constant 0 : i32
    return %c0_i32, %c0_i32_0 : i32, i32
  }
  func.func @transform_3(%arg0: i32) -> (i32, i32) {
    %c0_i32 = arith.constant 0 : i32
    %c0_i32_0 = arith.constant 0 : i32
    return %arg0, %c0_i32 : i32, i32
  }
}

module attributes {stable_mosaic.version = 11 : i64} {
  func.func @_gemm_bias_relu_kernel(%arg0: i32, %arg1: memref<16x256xbf16, #tpu.memory_space<vmem>>, %arg2: memref<256x128xbf16, #tpu.memory_space<vmem>>, %arg3: memref<1x128xf32, #tpu.memory_space<vmem>>, %arg4: memref<16x128xf32, #tpu.memory_space<vmem>>) attributes {dimension_semantics = [#tpu.dimension_semantics<parallel>], iteration_bounds = array<i64: 1>, scalar_prefetch = 0 : i64, scratch_operands = 0 : i64, tpu.core_type = #tpu.core_type<tc>, window_params = [{transform_indices = @transform_0, window_bounds = array<i64: 16, 256>}, {pipeline_mode = #tpu.pipeline_mode<synchronous>, transform_indices = @transform_1, window_bounds = array<i64: 256, 128>}, {pipeline_mode = #tpu.pipeline_mode<synchronous>, transform_indices = @transform_2, window_bounds = array<i64: 1, 128>}, {transform_indices = @transform_3, window_bounds = array<i64: 16, 128>}]} {
    %c0 = arith.constant 0 : index
    %c0_0 = arith.constant 0 : index
    %0 = vector.load %arg1[%c0, %c0_0] : memref<16x256xbf16, #tpu.memory_space<vmem>>, vector<16x256xbf16>
    %c0_1 = arith.constant 0 : index
    %c0_2 = arith.constant 0 : index
    %1 = vector.load %arg2[%c0_1, %c0_2] : memref<256x128xbf16, #tpu.memory_space<vmem>>, vector<256x128xbf16>
    %cst = arith.constant dense<0.000000e+00> : vector<16x128xf32>
    %2 = tpu.matmul %0, %1, %cst {dimension_numbers = #tpu.dot_dimension_numbers<[1], [0], [0], [1], [0, 0, 1, 1], [], []>} : vector<16x256xbf16>, vector<256x128xbf16>, vector<16x128xf32> -> vector<16x128xf32>
    %c0_3 = arith.constant 0 : index
    %c0_4 = arith.constant 0 : index
    %3 = vector.load %arg3[%c0_3, %c0_4] : memref<1x128xf32, #tpu.memory_space<vmem>>, vector<1x128xf32>
    %4 = vector.broadcast %3 : vector<1x128xf32> to vector<16x128xf32>
    %5 = arith.addf %2, %4 : vector<16x128xf32>
    %cst_5 = arith.constant 0.000000e+00 : f32
    %6 = vector.broadcast %cst_5 : f32 to vector<16x128xf32>
    %7 = arith.maximumf %5, %6 : vector<16x128xf32>
    %c0_6 = arith.constant 0 : index
    %c0_7 = arith.constant 0 : index
    %8 = vector.load %arg4[%c0_6, %c0_7] : memref<16x128xf32, #tpu.memory_space<vmem>>, vector<16x128xf32>
    tpu.vector_store %arg4[%c0_6, %c0_7], %7 {strides = array<i32>} : memref<16x128xf32, #tpu.memory_space<vmem>>, vector<16x128xf32>,
    return
  }
  func.func @transform_0(%arg0: i32) -> (i32, i32) {
    %c0_i32 = arith.constant 0 : i32
    %c0_i32_0 = arith.constant 0 : i32
    return %arg0, %c0_i32 : i32, i32
  }
  func.func @transform_1(%arg0: i32) -> (i32, i32) {
    %c0_i32 = arith.constant 0 : i32
    %c0_i32_0 = arith.constant 0 : i32
    %c0_i32_1 = arith.constant 0 : i32
    return %c0_i32, %c0_i32_0 : i32, i32
  }
  func.func @transform_2(%arg0: i32) -> (i32, i32) {
    %c0_i32 = arith.constant 0 : i32
    %c0_i32_0 = arith.constant 0 : i32
    %c0_i32_1 = arith.constant 0 : i32
    return %c0_i32, %c0_i32_0 : i32, i32
  }
  func.func @transform_3(%arg0: i32) -> (i32, i32) {
    %c0_i32 = arith.constant 0 : i32
    %c0_i32_0 = arith.constant 0 : i32
    return %arg0, %c0_i32 : i32, i32
  }
}

module attributes {stable_mosaic.version = 11 : i64} {
  func.func @_gemm_bias_relu_kernel(%arg0: i32, %arg1: memref<16x384xbf16, #tpu.memory_space<vmem>>, %arg2: memref<384x128xbf16, #tpu.memory_space<vmem>>, %arg3: memref<1x128xf32, #tpu.memory_space<vmem>>, %arg4: memref<16x128xf32, #tpu.memory_space<vmem>>) attributes {dimension_semantics = [#tpu.dimension_semantics<parallel>], iteration_bounds = array<i64: 1>, scalar_prefetch = 0 : i64, scratch_operands = 0 : i64, tpu.core_type = #tpu.core_type<tc>, window_params = [{transform_indices = @transform_0, window_bounds = array<i64: 16, 384>}, {pipeline_mode = #tpu.pipeline_mode<synchronous>, transform_indices = @transform_1, window_bounds = array<i64: 384, 128>}, {pipeline_mode = #tpu.pipeline_mode<synchronous>, transform_indices = @transform_2, window_bounds = array<i64: 1, 128>}, {transform_indices = @transform_3, window_bounds = array<i64: 16, 128>}]} {
    %c0 = arith.constant 0 : index
    %c0_0 = arith.constant 0 : index
    %0 = vector.load %arg1[%c0, %c0_0] : memref<16x384xbf16, #tpu.memory_space<vmem>>, vector<16x384xbf16>
    %c0_1 = arith.constant 0 : index
    %c0_2 = arith.constant 0 : index
    %1 = vector.load %arg2[%c0_1, %c0_2] : memref<384x128xbf16, #tpu.memory_space<vmem>>, vector<384x128xbf16>
    %cst = arith.constant dense<0.000000e+00> : vector<16x128xf32>
    %2 = tpu.matmul %0, %1, %cst {dimension_numbers = #tpu.dot_dimension_numbers<[1], [0], [0], [1], [0, 0, 1, 1], [], []>} : vector<16x384xbf16>, vector<384x128xbf16>, vector<16x128xf32> -> vector<16x128xf32>
    %c0_3 = arith.constant 0 : index
    %c0_4 = arith.constant 0 : index
    %3 = vector.load %arg3[%c0_3, %c0_4] : memref<1x128xf32, #tpu.memory_space<vmem>>, vector<1x128xf32>
    %4 = vector.broadcast %3 : vector<1x128xf32> to vector<16x128xf32>
    %5 = arith.addf %2, %4 : vector<16x128xf32>
    %cst_5 = arith.constant 0.000000e+00 : f32
    %6 = vector.broadcast %cst_5 : f32 to vector<16x128xf32>
    %7 = arith.maximumf %5, %6 : vector<16x128xf32>
    %c0_6 = arith.constant 0 : index
    %c0_7 = arith.constant 0 : index
    %8 = vector.load %arg4[%c0_6, %c0_7] : memref<16x128xf32, #tpu.memory_space<vmem>>, vector<16x128xf32>
    tpu.vector_store %arg4[%c0_6, %c0_7], %7 {strides = array<i32>} : memref<16x128xf32, #tpu.memory_space<vmem>>, vector<16x128xf32>,
    return
  }
  func.func @transform_0(%arg0: i32) -> (i32, i32) {
    %c0_i32 = arith.constant 0 : i32
    %c0_i32_0 = arith.constant 0 : i32
    return %arg0, %c0_i32 : i32, i32
  }
  func.func @transform_1(%arg0: i32) -> (i32, i32) {
    %c0_i32 = arith.constant 0 : i32
    %c0_i32_0 = arith.constant 0 : i32
    %c0_i32_1 = arith.constant 0 : i32
    return %c0_i32, %c0_i32_0 : i32, i32
  }
  func.func @transform_2(%arg0: i32) -> (i32, i32) {
    %c0_i32 = arith.constant 0 : i32
    %c0_i32_0 = arith.constant 0 : i32
    %c0_i32_1 = arith.constant 0 : i32
    return %c0_i32, %c0_i32_0 : i32, i32
  }
  func.func @transform_3(%arg0: i32) -> (i32, i32) {
    %c0_i32 = arith.constant 0 : i32
    %c0_i32_0 = arith.constant 0 : i32
    return %arg0, %c0_i32 : i32, i32
  }
}

</mosaic_0001>

<bundles_post_ra>
// kernel: midas_encoder_forward.4
= control target key start
LH: loop header
LB: loop body
LE: loop exit
PB: predicated region body
PF: predicated region fallthrough
CT: control target
= control target key end

     0   :  { %s499_s1 = inlined_call_operand.vmem [shape: bf16[128,128], index: 1, kind: input, shape index: {}]   ;;  %s500_s0 = inlined_call_operand.vmem [shape: bf16[128,128], index: 0, kind: input, shape index: {}]   ;;  %s501_s2 = inlined_call_operand.vmem [shape: f32[1,128], index: 2, kind: input, shape index: {}]   ;;  %s502_s3 = inlined_call_operand.vmem [shape: f32[128,128], index: 3, kind: output, shape index: {}]  }
   0x1   :  { %v364_v0 = vld [vmem:[%s499_s1 + $0x38] sm:$0xff]   ;;  %v365_v1 = vld [vmem:[%s499_s1 + $0x30] sm:$0xff]   ;;  %v366_v2 = vld [vmem:[%s499_s1 + $0x28] sm:$0xff]  }
   0x2   :  { %316 = vmatprep.subr.bf16.mxu0 %v364_v0  ;;  %348 = vmatprep.subr.bf16.mxu1 %v364_v0  ;;  %v367_v3 = vld [vmem:[%s499_s1 + $0x20] sm:$0xff]   ;;  %v368_v6 = vld [vmem:[%s499_s1 + $0x18] sm:$0xff]   ;;  %v369_v7 = vld [vmem:[%s499_s1 + $0x10] sm:$0xff]  }
   0x3   :  { %317 = vmatpush3.bf16.msra.mxu0 %v364_v0  ;;  %356 = vmatpush3.bf16.msra.mxu1 %v364_v0  ;;  %v372_v4 = vld [vmem:[%s500_s0] sm:$0xff]   ;;  %v370_v8 = vld [vmem:[%s499_s1 + $0x8] sm:$0xff]   ;;  %v376_v12 = vld [vmem:[%s500_s0 + $0x10] sm:$0xff]  }
   0x4   :  { %318 = vmatprep.subr.bf16.mxu0 %v365_v1  ;;  %349 = vmatprep.subr.bf16.mxu1 %v365_v1  ;;  %v373_v5 = vld [vmem:[%s500_s0 + $0x20] sm:$0xff]   ;;  %v374_v10 = vld [vmem:[%s500_s0 + $0x8] sm:$0xff]   ;;  %v377_v13 = vld [vmem:[%s500_s0 + $0x30] sm:$0xff]  }
   0x5   :  { %332 = vmatprep.mubr.bf16.mxu0 %v372_v4  ;;  %340 = vmatprep.mubr.bf16.mxu1 %v373_v5  ;;  %v371_v9 = vld [vmem:[%s499_s1] sm:$0xff]   ;;  %v375_v11 = vld [vmem:[%s500_s0 + $0x28] sm:$0xff]   ;;  %v378_v14 = vld [vmem:[%s500_s0 + $0x18] sm:$0xff]  }
   0x6   :  { %v379_v15 = vld [vmem:[%s500_s0 + $0x38] sm:$0xff]   ;;  %v283_v16 = vld [vmem:[%s501_s2] ss:$0 sm:$0xff] }
   0x7   :  { %319 = vmatpush3.bf16.msra.mxu0 %v365_v1  ;;  %357 = vmatpush3.bf16.msra.mxu1 %v365_v1 }
   0x8   :  { %320 = vmatprep.subr.bf16.mxu0 %v366_v2  ;;  %350 = vmatprep.subr.bf16.mxu1 %v366_v2 }
   0xb   :  { %321 = vmatpush3.bf16.msra.mxu0 %v366_v2  ;;  %358 = vmatpush3.bf16.msra.mxu1 %v366_v2 }
   0xc   :  { %322 = vmatprep.subr.bf16.mxu0 %v367_v3  ;;  %351 = vmatprep.subr.bf16.mxu1 %v367_v3 }
   0xf   :  { %323 = vmatpush3.bf16.msra.mxu0 %v367_v3  ;;  %359 = vmatpush3.bf16.msra.mxu1 %v367_v3 }
  0x10   :  { %324 = vmatprep.subr.bf16.mxu0 %v368_v6  ;;  %352 = vmatprep.subr.bf16.mxu1 %v368_v6 }
  0x13   :  { %325 = vmatpush3.bf16.msra.mxu0 %v368_v6  ;;  %360 = vmatpush3.bf16.msra.mxu1 %v368_v6 }
  0x14   :  { %326 = vmatprep.subr.bf16.mxu0 %v369_v7  ;;  %353 = vmatprep.subr.bf16.mxu1 %v369_v7 }
  0x17   :  { %327 = vmatpush3.bf16.msra.mxu0 %v369_v7  ;;  %361 = vmatpush3.bf16.msra.mxu1 %v369_v7 }
  0x18   :  { %328 = vmatprep.subr.bf16.mxu0 %v370_v8  ;;  %354 = vmatprep.subr.bf16.mxu1 %v370_v8 }
  0x1b   :  { %329 = vmatpush3.bf16.msra.mxu0 %v370_v8  ;;  %362 = vmatpush3.bf16.msra.mxu1 %v370_v8 }
  0x1c   :  { %330 = vmatprep.subr.bf16.mxu0 %v371_v9  ;;  %355 = vmatprep.subr.bf16.mxu1 %v371_v9 }
  0x1f   :  { %331 = vmatpush3.bf16.msra.mxu0 %v371_v9  ;;  %363 = vmatpush3.bf16.msra.mxu1 %v371_v9 }
  0x22   :  { %333 = vmatmul.mubr.bf16.vlgmr.msra.gmra.mxu0 %v374_v10  ;;  %341 = vmatmul.mubr.bf16.vlgmr.msra.gmra.mxu1 %v375_v11 }
  0x23   :  { %336 = vmatprep.mubr.bf16.mxu0 %v376_v12  ;;  %344 = vmatprep.mubr.bf16.mxu1 %v377_v13 }
  0x2a   :  { %337 = vmatmul.mubr.bf16.gmra.mxu0 %v378_v14  ;;  %345 = vmatmul.mubr.bf16.gmra.mxu1 %v379_v15 }
  0xe2   :  { %v334_v17 = vpop.f32.mrf.mxu0  ;;  %v342_v18 = vpop.f32.mrf.mxu1 }
  0xe3   :  { %v193_v19 = vadd.f32 %v334_v17, %v283_v16  ;;  %v225_v20 = vadd.f32 %v342_v18, %v283_v16 }
  0xe4   :  { %v184_v21 = vpop.f32.mrf.mxu0  ;;  %v216_v22 = vpop.f32.mrf.mxu1 }
  0xe5   :  { %v249_v23 = vmax.f32 %v193_v19, 0.0  ;;  %v257_v24 = vmax.f32 %v225_v20, 0.0  ;;  %v185_v25 = vadd.f32 %v283_v16, %v184_v21  ;;  %v217_v26 = vadd.f32 %v283_v16, %v216_v22 }
  0xe6   :  { %v335_v27 = vpop.f32.mrf.mxu0  ;;  %v343_v28 = vpop.f32.mrf.mxu1 }
  0xe7   :  { %265 = vst [vmem:[%s502_s3 + $0x10] sm:$0xff] %v249_v23  ;;  %273 = vst [vmem:[%s502_s3 + $0x50] sm:$0xff] %v257_v24  ;;  %v247_v29 = vmax.f32 %v185_v25, 0.0  ;;  %v255_v30 = vmax.f32 %v217_v26, 0.0  ;;  %v196_v31 = vadd.f32 %v335_v27, %v283_v16  ;;  %v228_v32 = vadd.f32 %v343_v28, %v283_v16 }
  0xe8   :  { %v187_v33 = vpop.f32.mrf.mxu0  ;;  %v219_v34 = vpop.f32.mrf.mxu1 }
  0xe9   :  { %263 = vst [vmem:[%s502_s3] sm:$0xff] %v247_v29  ;;  %271 = vst [vmem:[%s502_s3 + $0x40] sm:$0xff] %v255_v30  ;;  %v250_v35 = vmax.f32 %v196_v31, 0.0  ;;  %v258_v36 = vmax.f32 %v228_v32, 0.0  ;;  %v188_v37 = vadd.f32 %v283_v16, %v187_v33  ;;  %v220_v38 = vadd.f32 %v283_v16, %v219_v34 }
  0xea   :  { %v338_v39 = vpop.f32.mrf.mxu0  ;;  %v346_v40 = vpop.f32.mrf.mxu1 }
  0xeb   :  { %266 = vst [vmem:[%s502_s3 + $0x18] sm:$0xff] %v250_v35  ;;  %274 = vst [vmem:[%s502_s3 + $0x58] sm:$0xff] %v258_v36  ;;  %v248_v41 = vmax.f32 %v188_v37, 0.0  ;;  %v256_v42 = vmax.f32 %v220_v38, 0.0  ;;  %v209_v43 = vadd.f32 %v338_v39, %v283_v16  ;;  %v241_v44 = vadd.f32 %v346_v40, %v283_v16 }
  0xec   :  { %v200_v45 = vpop.f32.mrf.mxu0  ;;  %v232_v46 = vpop.f32.mrf.mxu1 }
  0xed   :  { %264 = vst [vmem:[%s502_s3 + $0x8] sm:$0xff] %v248_v41  ;;  %272 = vst [vmem:[%s502_s3 + $0x48] sm:$0xff] %v256_v42  ;;  %v253_v47 = vmax.f32 %v209_v43, 0.0  ;;  %v261_v48 = vmax.f32 %v241_v44, 0.0  ;;  %v201_v49 = vadd.f32 %v283_v16, %v200_v45  ;;  %v233_v50 = vadd.f32 %v283_v16, %v232_v46 }
  0xee   :  { %v339_v51 = vpop.f32.mrf.mxu0  ;;  %v347_v52 = vpop.f32.mrf.mxu1 }
  0xef   :  { %269 = vst [vmem:[%s502_s3 + $0x30] sm:$0xff] %v253_v47  ;;  %277 = vst [vmem:[%s502_s3 + $0x70] sm:$0xff] %v261_v48  ;;  %v251_v53 = vmax.f32 %v201_v49, 0.0  ;;  %v259_v54 = vmax.f32 %v233_v50, 0.0  ;;  %v212_v55 = vadd.f32 %v339_v51, %v283_v16  ;;  %v244_v56 = vadd.f32 %v347_v52, %v283_v16 }
  0xf0   :  { %v203_v57 = vpop.f32.mrf.mxu0  ;;  %v235_v58 = vpop.f32.mrf.mxu1 }
  0xf1   :  { %267 = vst [vmem:[%s502_s3 + $0x20] sm:$0xff] %v251_v53  ;;  %275 = vst [vmem:[%s502_s3 + $0x60] sm:$0xff] %v259_v54  ;;  %v254_v59 = vmax.f32 %v212_v55, 0.0  ;;  %v262_v60 = vmax.f32 %v244_v56, 0.0  ;;  %v204_v61 = vadd.f32 %v283_v16, %v203_v57  ;;  %v236_v62 = vadd.f32 %v283_v16, %v235_v58 }
  0xf3   :  { %270 = vst [vmem:[%s502_s3 + $0x38] sm:$0xff] %v254_v59  ;;  %278 = vst [vmem:[%s502_s3 + $0x78] sm:$0xff] %v262_v60  ;;  %v252_v63 = vmax.f32 %v204_v61, 0.0  ;;  %v260_v0 = vmax.f32 %v236_v62, 0.0 }
  0xf5   :  { %268 = vst [vmem:[%s502_s3 + $0x28] sm:$0xff] %v252_v63  ;;  %276 = vst [vmem:[%s502_s3 + $0x68] sm:$0xff] %v260_v0 }

// kernel: midas_encoder_forward.5
= control target key start
LH: loop header
LB: loop body
LE: loop exit
PB: predicated region body
PF: predicated region fallthrough
CT: control target
= control target key end

     0   :  { %s279_s1 = inlined_call_operand.vmem [shape: bf16[128,128], index: 1, kind: input, shape index: {}]   ;;  %s280_s0 = inlined_call_operand.vmem [shape: bf16[32,128], index: 0, kind: input, shape index: {}]   ;;  %s281_s2 = inlined_call_operand.vmem [shape: f32[1,128], index: 2, kind: input, shape index: {}]   ;;  %s282_s3 = inlined_call_operand.vmem [shape: f32[32,128], index: 3, kind: output, shape index: {}]  }
   0x1   :  { %v204_v0 = vld [vmem:[%s279_s1 + $0x38] sm:$0xff]   ;;  %v205_v1 = vld [vmem:[%s279_s1 + $0x30] sm:$0xff]   ;;  %v206_v2 = vld [vmem:[%s279_s1 + $0x28] sm:$0xff]  }
   0x2   :  { %184 = vmatprep.subr.bf16.mxu0 %v204_v0  ;;  %v207_v3 = vld [vmem:[%s279_s1 + $0x20] sm:$0xff]   ;;  %v208_v5 = vld [vmem:[%s279_s1 + $0x18] sm:$0xff]   ;;  %v209_v6 = vld [vmem:[%s279_s1 + $0x10] sm:$0xff]  }
   0x3   :  { %185 = vmatpush3.bf16.msra.mxu0 %v204_v0  ;;  %v212_v4 = vld [vmem:[%s280_s0] sm:$0xff]   ;;  %v210_v7 = vld [vmem:[%s279_s1 + $0x8] sm:$0xff]  }
   0x4   :  { %186 = vmatprep.subr.bf16.mxu0 %v205_v1  ;;  %200 = vmatprep.mubr.bf16.mxu0 %v212_v4  ;;  %v211_v8 = vld [vmem:[%s279_s1] sm:$0xff]   ;;  %v213_v9 = vld [vmem:[%s280_s0 + $0x8] sm:$0xff]  }
   0x5   :  { %v163_v10 = vld [vmem:[%s281_s2] ss:$0 sm:$0xff] }
   0x7   :  { %187 = vmatpush3.bf16.msra.mxu0 %v205_v1 }
   0x8   :  { %188 = vmatprep.subr.bf16.mxu0 %v206_v2 }
   0xb   :  { %189 = vmatpush3.bf16.msra.mxu0 %v206_v2 }
   0xc   :  { %190 = vmatprep.subr.bf16.mxu0 %v207_v3 }
   0xf   :  { %191 = vmatpush3.bf16.msra.mxu0 %v207_v3 }
  0x10   :  { %192 = vmatprep.subr.bf16.mxu0 %v208_v5 }
  0x13   :  { %193 = vmatpush3.bf16.msra.mxu0 %v208_v5 }
  0x14   :  { %194 = vmatprep.subr.bf16.mxu0 %v209_v6 }
  0x17   :  { %195 = vmatpush3.bf16.msra.mxu0 %v209_v6 }
  0x18   :  { %196 = vmatprep.subr.bf16.mxu0 %v210_v7 }
  0x1b   :  { %197 = vmatpush3.bf16.msra.mxu0 %v210_v7 }
  0x1c   :  { %198 = vmatprep.subr.bf16.mxu0 %v211_v8 }
  0x1f   :  { %199 = vmatpush3.bf16.msra.mxu0 %v211_v8 }
  0x22   :  { %201 = vmatmul.mubr.bf16.vlgmr.msra.gmra.mxu0 %v213_v9 }
  0xe2   :  { %v202_v11 = vpop.f32.mrf.mxu0 }
  0xe3   :  { %v145_v12 = vadd.f32 %v202_v11, %v163_v10 }
  0xe4   :  { %v136_v13 = vpop.f32.mrf.mxu0 }
  0xe5   :  { %v153_v14 = vmax.f32 %v145_v12, 0.0  ;;  %v137_v15 = vadd.f32 %v163_v10, %v136_v13 }
  0xe6   :  { %v203_v16 = vpop.f32.mrf.mxu0 }
  0xe7   :  { %157 = vst [vmem:[%s282_s3 + $0x10] sm:$0xff] %v153_v14  ;;  %v151_v17 = vmax.f32 %v137_v15, 0.0  ;;  %v148_v18 = vadd.f32 %v203_v16, %v163_v10 }
  0xe8   :  { %v139_v19 = vpop.f32.mrf.mxu0 }
  0xe9   :  { %155 = vst [vmem:[%s282_s3] sm:$0xff] %v151_v17  ;;  %v154_v20 = vmax.f32 %v148_v18, 0.0  ;;  %v140_v21 = vadd.f32 %v163_v10, %v139_v19 }
  0xeb   :  { %158 = vst [vmem:[%s282_s3 + $0x18] sm:$0xff] %v154_v20  ;;  %v152_v22 = vmax.f32 %v140_v21, 0.0 }
  0xed   :  { %156 = vst [vmem:[%s282_s3 + $0x8] sm:$0xff] %v152_v22 }

// kernel: midas_encoder_forward.6
= control target key start
LH: loop header
LB: loop body
LE: loop exit
PB: predicated region body
PF: predicated region fallthrough
CT: control target
= control target key end

     0   :  { %s354_s1 = inlined_call_operand.vmem [shape: bf16[256,128], index: 1, kind: input, shape index: {}]   ;;  %s355_s0 = inlined_call_operand.vmem [shape: bf16[16,256], index: 0, kind: input, shape index: {}]   ;;  %s356_s2 = inlined_call_operand.vmem [shape: f32[1,128], index: 2, kind: input, shape index: {}]   ;;  %s357_s3 = inlined_call_operand.vmem [shape: f32[16,128], index: 3, kind: output, shape index: {}]  }
   0x1   :  { %v252_v0 = vld [vmem:[%s354_s1 + $0x78] sm:$0xff]   ;;  %v254_v2 = vld [vmem:[%s354_s1 + $0x70] sm:$0xff]   ;;  %v256_v4 = vld [vmem:[%s354_s1 + $0x68] sm:$0xff]  }
   0x2   :  { %v253_v1 = vld [vmem:[%s354_s1 + $0x38] sm:$0xff]   ;;  %230 = vmatprep.subr.bf16.mxu0 %v252_v0  ;;  %v255_v3 = vld [vmem:[%s354_s1 + $0x30] sm:$0xff]   ;;  %v257_v5 = vld [vmem:[%s354_s1 + $0x28] sm:$0xff]  }
   0x3   :  { %231 = vmatpush3.bf16.msra.mxu0 %v253_v1  ;;  %v258_v6 = vld [vmem:[%s354_s1 + $0x60] sm:$0xff]   ;;  %v260_v8 = vld [vmem:[%s354_s1 + $0x58] sm:$0xff]   ;;  %v262_v10 = vld [vmem:[%s354_s1 + $0x50] sm:$0xff]  }
   0x4   :  { %232 = vmatprep.subr.bf16.mxu0 %v254_v2  ;;  %v259_v7 = vld [vmem:[%s354_s1 + $0x20] sm:$0xff]   ;;  %v261_v9 = vld [vmem:[%s354_s1 + $0x18] sm:$0xff]   ;;  %v263_v12 = vld [vmem:[%s354_s1 + $0x10] sm:$0xff]  }
   0x5   :  { %v270_v11 = vld [vmem:[%s355_s0 + $0x4] ss:$8 sps:$4 sm:$0xff]   ;;  %v268_v17 = vld [vmem:[%s355_s0] ss:$8 sps:$4 sm:$0xff]  }
   0x6   :  { %194 = vmatprep.mubr.bf16.mxu0 %v270_v11  ;;  %v264_v13 = vld [vmem:[%s354_s1 + $0x48] sm:$0xff]   ;;  %v266_v15 = vld [vmem:[%s354_s1 + $0x40] sm:$0xff]  }
   0x7   :  { %233 = vmatpush3.bf16.msra.mxu0 %v255_v3  ;;  %v265_v14 = vld [vmem:[%s354_s1 + $0x8] sm:$0xff]   ;;  %v267_v16 = vld [vmem:[%s354_s1] sm:$0xff]  }
   0x8   :  { %234 = vmatprep.subr.bf16.mxu0 %v256_v4  ;;  %v211_v19 = vld [vmem:[%s356_s2] ss:$0 sm:$0xff] }
   0xb   :  { %235 = vmatpush3.bf16.msra.mxu0 %v257_v5 }
   0xc   :  { %236 = vmatprep.subr.bf16.mxu0 %v258_v6 }
   0xf   :  { %237 = vmatpush3.bf16.msra.mxu0 %v259_v7 }
  0x10   :  { %238 = vmatprep.subr.bf16.mxu0 %v260_v8 }
  0x13   :  { %239 = vmatpush3.bf16.msra.mxu0 %v261_v9 }
  0x14   :  { %240 = vmatprep.subr.bf16.mxu0 %v262_v10 }
  0x17   :  { %241 = vmatpush3.bf16.msra.mxu0 %v263_v12 }
  0x18   :  { %242 = vmatprep.subr.bf16.mxu0 %v264_v13 }
  0x1b   :  { %243 = vmatpush3.bf16.msra.mxu0 %v265_v14 }
  0x1c   :  { %244 = vmatprep.subr.bf16.mxu0 %v266_v15 }
  0x1f   :  { %245 = vmatpush3.bf16.msra.mxu0 %v267_v16 }
  0x22   :  { %195 = vmatmul.mubr.bf16.vlgmr.msra.gmra.mxu0 %v268_v17 }
  0xe2   :  { %v246_v18 = vpop.f32.mrf.mxu0 }
  0xe4   :  { %v247_v20 = vpop.f32.mrf.mxu0 }
  0xe5   :  { %v248_v21 = vadd.f32 %v247_v20, %v246_v18 }
  0xe6   :  { %v249_v22 = vpop.f32.mrf.mxu0 }
  0xe7   :  { %v197_v23 = vadd.f32 %v248_v21, %v211_v19 }
  0xe8   :  { %v250_v24 = vpop.f32.mrf.mxu0 }
  0xe9   :  { %v203_v25 = vmax.f32 %v197_v23, 0.0  ;;  %v251_v26 = vadd.f32 %v250_v24, %v249_v22 }
  0xeb   :  { %205 = vst [vmem:[%s357_s3] sm:$0xff] %v203_v25  ;;  %v200_v27 = vadd.f32 %v251_v26, %v211_v19 }
  0xed   :  { %v204_v28 = vmax.f32 %v200_v27, 0.0 }
  0xef   :  { %206 = vst [vmem:[%s357_s3 + $0x8] sm:$0xff] %v204_v28 }

// kernel: midas_encoder_forward.7
= control target key start
LH: loop header
LB: loop body
LE: loop exit
PB: predicated region body
PF: predicated region fallthrough
CT: control target
= control target key end

     0   :  { %v433_v1 = vmov 0.0   ;;  %vm434_vm0 = vmmov 0   ;;  %s545_s1 = inlined_call_operand.vmem [shape: bf16[384,128], index: 1, kind: input, shape index: {}]   ;;  %s546_s0 = inlined_call_operand.vmem [shape: bf16[16,384], index: 0, kind: input, shape index: {}]   ;;  %s547_s2 = inlined_call_operand.vmem [shape: f32[1,128], index: 2, kind: input, shape index: {}]   ;;  %s548_s3 = inlined_call_operand.vmem [shape: f32[16,128], index: 3, kind: output, shape index: {}]  }
   0x1   :  { %v405_v0 = vld [vmem:[%s545_s1 + $0x78] sm:$0xff]   ;;  %383 = vmatprep.subr.bf16.mxu1 %v433_v1  ;;  %399 = vmatprep.mubr.msk.bf16.mxu1 %vm434_vm0, %v433_v1  ;;  %v408_v4 = vld [vmem:[%s545_s1 + $0x70] sm:$0xff]   ;;  %v411_v7 = vld [vmem:[%s545_s1 + $0x68] sm:$0xff]  }
   0x2   :  { %v406_v2 = vld [vmem:[%s545_s1 + $0x38] sm:$0xff]   ;;  %352 = vmatprep.subr.bf16.mxu0 %v405_v0  ;;  %v409_v5 = vld [vmem:[%s545_s1 + $0x30] sm:$0xff]   ;;  %v412_v8 = vld [vmem:[%s545_s1 + $0x28] sm:$0xff]  }
   0x3   :  { %v407_v3 = vld [vmem:[%s545_s1 + $0xb8] sm:$0xff]   ;;  %353 = vmatpush3.bf16.msra.mxu0 %v406_v2  ;;  %v410_v6 = vld [vmem:[%s545_s1 + $0xb0] sm:$0xff]   ;;  %v413_v9 = vld [vmem:[%s545_s1 + $0xa8] sm:$0xff]  }
   0x4   :  { %384 = vmatpush3.bf16.msra.mxu1 %v407_v3  ;;  %354 = vmatprep.subr.bf16.mxu0 %v408_v4  ;;  %v414_v10 = vld [vmem:[%s545_s1 + $0x60] sm:$0xff]   ;;  %v417_v13 = vld [vmem:[%s545_s1 + $0x58] sm:$0xff]   ;;  %v420_v16 = vld [vmem:[%s545_s1 + $0x50] sm:$0xff]  }
   0x5   :  { %385 = vmatprep.subr.bf16.mxu1 %v433_v1  ;;  %v415_v11 = vld [vmem:[%s545_s1 + $0x20] sm:$0xff]   ;;  %v418_v14 = vld [vmem:[%s545_s1 + $0x18] sm:$0xff]   ;;  %v421_v17 = vld [vmem:[%s545_s1 + $0x10] sm:$0xff]  }
   0x6   :  { %v416_v12 = vld [vmem:[%s545_s1 + $0xa0] sm:$0xff]   ;;  %v419_v15 = vld [vmem:[%s545_s1 + $0x98] sm:$0xff]   ;;  %v422_v18 = vld [vmem:[%s545_s1 + $0x90] sm:$0xff]  }
   0x7   :  { %355 = vmatpush3.bf16.msra.mxu0 %v409_v5  ;;  %v423_v19 = vld [vmem:[%s545_s1 + $0x48] sm:$0xff]   ;;  %v426_v22 = vld [vmem:[%s545_s1 + $0x40] sm:$0xff]  }
   0x8   :  { %386 = vmatpush3.bf16.msra.mxu1 %v410_v6  ;;  %356 = vmatprep.subr.bf16.mxu0 %v411_v7  ;;  %v424_v20 = vld [vmem:[%s545_s1 + $0x8] sm:$0xff]   ;;  %v431_v23 = vld [vmem:[%s546_s0 + $0x4] ss:$12 sps:$4 sm:$0xff]   ;;  %v324_v30 = vld [vmem:[%s547_s2] ss:$0 sm:$0xff] }
   0x9   :  { %387 = vmatprep.subr.bf16.mxu1 %v433_v1  ;;  %v425_v21 = vld [vmem:[%s545_s1 + $0x88] sm:$0xff]   ;;  %v427_v24 = vld [vmem:[%s545_s1] sm:$0xff]   ;;  %266 = vmatprep.mubr.bf16.mxu0 %v431_v23 }
   0xa   :  { %v428_v25 = vld [vmem:[%s545_s1 + $0x80] sm:$0xff]   ;;  %v432_v27 = vld [vmem:[%s546_s0 + $0x8] ss:$12 sps:$4 sm:$0xff]  }
   0xb   :  { %357 = vmatpush3.bf16.msra.mxu0 %v412_v8  ;;  %v429_v26 = vld [vmem:[%s546_s0] ss:$12 sps:$4 sm:$0xff]  }
   0xc   :  { %388 = vmatpush3.bf16.msra.mxu1 %v413_v9  ;;  %358 = vmatprep.subr.bf16.mxu0 %v414_v10 }
   0xd   :  { %389 = vmatprep.subr.bf16.mxu1 %v433_v1 }
   0xf   :  { %359 = vmatpush3.bf16.msra.mxu0 %v415_v11 }
  0x10   :  { %390 = vmatpush3.bf16.msra.mxu1 %v416_v12  ;;  %360 = vmatprep.subr.bf16.mxu0 %v417_v13 }
  0x11   :  { %391 = vmatprep.subr.bf16.mxu1 %v433_v1 }
  0x13   :  { %361 = vmatpush3.bf16.msra.mxu0 %v418_v14 }
  0x14   :  { %392 = vmatpush3.bf16.msra.mxu1 %v419_v15  ;;  %362 = vmatprep.subr.bf16.mxu0 %v420_v16 }
  0x15   :  { %393 = vmatprep.subr.bf16.mxu1 %v433_v1 }
  0x17   :  { %363 = vmatpush3.bf16.msra.mxu0 %v421_v17 }
  0x18   :  { %394 = vmatpush3.bf16.msra.mxu1 %v422_v18  ;;  %364 = vmatprep.subr.bf16.mxu0 %v423_v19 }
  0x19   :  { %395 = vmatprep.subr.bf16.mxu1 %v433_v1 }
  0x1b   :  { %365 = vmatpush3.bf16.msra.mxu0 %v424_v20 }
  0x1c   :  { %396 = vmatpush3.bf16.msra.mxu1 %v425_v21  ;;  %366 = vmatprep.subr.bf16.mxu0 %v426_v22 }
  0x1d   :  { %397 = vmatprep.subr.bf16.mxu1 %v433_v1 }
  0x1f   :  { %367 = vmatpush3.bf16.msra.mxu0 %v427_v24 }
  0x20   :  { %398 = vmatpush3.bf16.msra.mxu1 %v428_v25 }
  0x22   :  { %267 = vmatmul.mubr.bf16.vlgmr.msra.gmra.mxu0 %v429_v26 }
  0x23   :  { %400 = vmatmul.mubr.bf16.vlgmr.msra.gmra.mxu1 %v432_v27 }
  0xe2   :  { %v368_v28 = vpop.f32.mrf.mxu0 }
  0xe3   :  { %v309_v29 = vpop.f32.mrf.mxu1 }
  0xe4   :  { %v369_v31 = vpop.f32.mrf.mxu0 }
  0xe5   :  { %v370_v32 = vadd.f32 %v369_v31, %v368_v28  ;;  %v401_v33 = vpop.f32.mrf.mxu1 }
  0xe6   :  { %v371_v34 = vpop.f32.mrf.mxu0 }
  0xe7   :  { %v269_v35 = vadd.f32 %v370_v32, %v324_v30  ;;  %v312_v36 = vpop.f32.mrf.mxu1 }
  0xe8   :  { %v372_v37 = vpop.f32.mrf.mxu0 }
  0xe9   :  { %v310_v38 = vadd.f32 %v309_v29, %v269_v35  ;;  %v373_v39 = vadd.f32 %v372_v37, %v371_v34  ;;  %v402_v40 = vpop.f32.mrf.mxu1 }
  0xeb   :  { %v316_v41 = vmax.f32 %v310_v38, 0.0  ;;  %v272_v42 = vadd.f32 %v373_v39, %v324_v30 }
  0xed   :  { %318 = vst [vmem:[%s548_s3] sm:$0xff] %v316_v41  ;;  %v313_v43 = vadd.f32 %v312_v36, %v272_v42 }
  0xef   :  { %v317_v44 = vmax.f32 %v313_v43, 0.0 }
  0xf1   :  { %319 = vst [vmem:[%s548_s3 + $0x8] sm:$0xff] %v317_v44 }

</bundles_post_ra>
